<compile_context>
chip_gen: v6e
topology: v6e:2x2x1
jax: 0.10.0
libtpu: 0.0.40
codegen_flags: <defaults>
</compile_context>

<pallas_src>
import functools
import math

import jax
import jax.numpy as jnp
from jax.experimental import pallas as pl
from jax.experimental.pallas import tpu as pltpu

LN_EPS = 1e-5


def _sublayer_connection_kernel(dropout_p,
                                seed_ref,                                   # scalar prefetch (SMEM)
                                x_ref, gamma_ref, beta_ref, w_ref, b_ref,   # inputs
                                o_ref):                                     # output
    x = x_ref[...].astype(jnp.float32)                      # (TM, H)

    # ---- LayerNorm over last axis (single-pass moments, eps=1e-5, like nn.LayerNorm) ----
    mean = jnp.mean(x, axis=-1, keepdims=True)
    mean_sq = jnp.mean(x * x, axis=-1, keepdims=True)
    var = mean_sq - mean * mean
    xn = (x - mean) * jax.lax.rsqrt(var + LN_EPS)
    xn = xn * gamma_ref[...] + beta_ref[...]                 # (TM, H) f32

    # ---- sublayer: Linear(H -> H) on the MXU (bf16 inputs, f32 accumulation) ----
    sub = jnp.dot(xn.astype(jnp.bfloat16), w_ref[...],
                  preferred_element_type=jnp.float32) + b_ref[...]

    # ---- dropout (inverted dropout, training mode) ----
    # Portable counter-based hash RNG (murmur3-style finalizer) keyed on the GLOBAL
    # element index + seed, so the mask is independent of tile_m and works on both
    # real TPU lowering and the CPU/interpret path (pltpu.prng_* has no CPU lowering).
    if dropout_p > 0.0:
        tm, h = sub.shape
        rows = jax.lax.broadcasted_iota(jnp.int32, sub.shape, 0)
        cols = jax.lax.broadcasted_iota(jnp.int32, sub.shape, 1)
        gid = ((pl.program_id(0) * tm + rows) * h + cols).astype(jnp.uint32)
        seed_u = seed_ref[0].astype(jnp.uint32)
        hsh = gid ^ (seed_u * jnp.uint32(0x9E3779B9))
        hsh = (hsh ^ (hsh >> 16)) * jnp.uint32(0x85EBCA6B)
        hsh = (hsh ^ (hsh >> 13)) * jnp.uint32(0xC2B2AE35)
        hsh = hsh ^ (hsh >> 16)
        # integer-threshold compare: keep with probability (1 - p), no int->float convert
        threshold = jnp.uint32(int(round(dropout_p * 4294967296.0)) & 0xFFFFFFFF)
        keep = hsh >= threshold
        sub = jnp.where(keep, sub * (1.0 / (1.0 - dropout_p)), 0.0)

    # ---- residual connection ----
    o_ref[...] = (x + sub).astype(o_ref.dtype)


def sublayer_connection(x, gamma, beta, w, b, *, dropout_p=0.1, seed=0, tile_m=256):
    """x: (B, S, H) float32.  Returns x + dropout(Linear(LayerNorm(x))).

    Note: the Linear computes xn @ W (not xn @ W^T); weights imported from a real
    torch nn.Linear must be transposed first.
    """
    B, S, H = x.shape
    M = B * S
    x2 = x.reshape(M, H)

    # Pick the largest row tile <= requested that divides M (grid must tile exactly).
    tile_m = max(1, math.gcd(M, int(tile_m)))
    if tile_m % 8 != 0 and tile_m != M:
        tile_m = M  # fall back to a single full tile to satisfy (8, 128) tiling rules

    gamma2 = gamma.reshape(1, H).astype(jnp.float32)
    beta2 = beta.reshape(1, H).astype(jnp.float32)
    b2 = b.reshape(1, H).astype(jnp.float32)
    # Store the weight in bf16: halves its VMEM/DMA footprint and feeds the bf16 MXU.
    w_bf16 = w.astype(jnp.bfloat16)
    seed_arr = jnp.array([seed], dtype=jnp.int32)

    kernel = functools.partial(_sublayer_connection_kernel, float(dropout_p))

    # VMEM budget: double-buffered x/out tiles (f32) + double-buffered bf16 weight + params.
    # TODO(synk): for very large H (>= 4096) on v7x (64 MiB VMEM) the full weight should be
    # tiled along K/N with an f32 accumulator instead of being held resident.
    vmem_bytes = (2 * 2 * tile_m * H * 4      # x tile + out tile, double-buffered, f32
                  + 2 * H * H * 2             # weight, bf16, double-buffered
                  + 6 * H * 4                 # gamma / beta / bias
                  + (2 << 20))                # headroom
    vmem_limit = int(min(max(vmem_bytes, 16 * 1024 * 1024), 64 * 1024 * 1024))

    cost = pl.CostEstimate(
        flops=2 * M * H * H,
        transcendentals=M,
        bytes_accessed=2 * 4 * M * H + 2 * H * H,
    )

    out = pl.pallas_call(
        kernel,
        out_shape=jax.ShapeDtypeStruct((M, H), x.dtype),
        grid_spec=pltpu.PrefetchScalarGridSpec(
            num_scalar_prefetch=1,
            grid=(M // tile_m,),
            in_specs=[
                pl.BlockSpec((tile_m, H), lambda i, seed: (i, 0)),  # x rows
                pl.BlockSpec((1, H), lambda i, seed: (0, 0)),       # gamma
                pl.BlockSpec((1, H), lambda i, seed: (0, 0)),       # beta
                pl.BlockSpec((H, H), lambda i, seed: (0, 0)),       # W (bf16)
                pl.BlockSpec((1, H), lambda i, seed: (0, 0)),       # bias
            ],
            out_specs=pl.BlockSpec((tile_m, H), lambda i, seed: (i, 0)),
        ),
        compiler_params=pltpu.CompilerParams(
            dimension_semantics=("parallel",),   # row tiles are independent -> megacore-safe
            vmem_limit_bytes=vmem_limit,
        ),
        cost_estimate=cost,
    )(seed_arr, x2, gamma2, beta2, w_bf16, b2)

    return out.reshape(B, S, H)


def _reference(x, gamma, beta, w, b):
    """Pure-JAX reference with dropout_p = 0 (deterministic)."""
    mean = jnp.mean(x, axis=-1, keepdims=True)
    var = jnp.mean((x - mean) ** 2, axis=-1, keepdims=True)
    xn = (x - mean) * jax.lax.rsqrt(var + LN_EPS) * gamma + beta
    return x + (xn @ w + b)


if __name__ == "__main__":
    B, S, H = 2, 8, 128
    dropout_p = 0.1

    key = jax.random.PRNGKey(0)
    kx, kw, kb = jax.random.split(key, 3)

    x = jax.random.normal(kx, (B, S, H), dtype=jnp.float32)

    # LayerNorm params (nn.LayerNorm default init: weight=1, bias=0)
    gamma = jnp.ones((H,), dtype=jnp.float32)
    beta = jnp.zeros((H,), dtype=jnp.float32)

    # Deterministic sublayer = Linear(H, H)
    limit = 1.0 / (H ** 0.5)
    w = jax.random.uniform(kw, (H, H), minval=-limit, maxval=limit, dtype=jnp.float32)
    b = jax.random.uniform(kb, (H,), minval=-limit, maxval=limit, dtype=jnp.float32)

    # 1) deterministic path (dropout off) vs pure-JAX reference
    out_det = sublayer_connection(x, gamma, beta, w, b, dropout_p=0.0, seed=0)
    jax.block_until_ready(out_det)
    ref = _reference(x, gamma, beta, w, b)
    assert out_det.shape == (B, S, H)
    assert jnp.allclose(out_det, ref, atol=5e-2, rtol=5e-2)  # bf16 matmul tolerance

    # 2) training path with dropout
    out = sublayer_connection(x, gamma, beta, w, b, dropout_p=dropout_p, seed=42)
    jax.block_until_ready(out)
    assert out.shape == (B, S, H)
    assert jnp.all(jnp.isfinite(out))

    print("KERNEL_OK")
</pallas_src>

<mosaic_0001>
module attributes {stable_mosaic.version = 11 : i64} {
  func.func @_sublayer_connection_kernel(%arg0: i32, %arg1: memref<1xi32, #tpu.memory_space<smem>>, %arg2: memref<16x128xf32, #tpu.memory_space<vmem>>, %arg3: memref<1x128xf32, #tpu.memory_space<vmem>>, %arg4: memref<1x128xf32, #tpu.memory_space<vmem>>, %arg5: memref<128x128xbf16, #tpu.memory_space<vmem>>, %arg6: memref<1x128xf32, #tpu.memory_space<vmem>>, %arg7: memref<16x128xf32, #tpu.memory_space<vmem>>) attributes {dimension_semantics = [#tpu.dimension_semantics<parallel>], iteration_bounds = array<i64: 1>, scalar_prefetch = 1 : i64, scratch_operands = 0 : i64, tpu.core_type = #tpu.core_type<tc>, window_params = [{transform_indices = @transform_0, window_bounds = array<i64: 16, 128>}, {pipeline_mode = #tpu.pipeline_mode<synchronous>, transform_indices = @transform_1, window_bounds = array<i64: 1, 128>}, {pipeline_mode = #tpu.pipeline_mode<synchronous>, transform_indices = @transform_2, window_bounds = array<i64: 1, 128>}, {pipeline_mode = #tpu.pipeline_mode<synchronous>, transform_indices = @transform_3, window_bounds = array<i64: 128, 128>}, {pipeline_mode = #tpu.pipeline_mode<synchronous>, transform_indices = @transform_4, window_bounds = array<i64: 1, 128>}, {transform_indices = @transform_5, window_bounds = array<i64: 16, 128>}]} {
    %c0 = arith.constant 0 : index
    %c0_0 = arith.constant 0 : index
    %0 = vector.load %arg2[%c0, %c0_0] : memref<16x128xf32, #tpu.memory_space<vmem>>, vector<16x128xf32>
    %cst = arith.constant dense<0.000000e+00> : vector<16xf32>
    %1 = vector.multi_reduction <add>, %0, %cst [1] : vector<16x128xf32> to vector<16xf32>
    %2 = vector.shape_cast %1 : vector<16xf32> to vector<16x1xf32>
    %cst_1 = arith.constant 1.280000e+02 : f32
    %3 = vector.broadcast %cst_1 : f32 to vector<16x1xf32>
    %4 = arith.divf %2, %3 : vector<16x1xf32>
    %5 = arith.mulf %0, %0 : vector<16x128xf32>
    %cst_2 = arith.constant dense<0.000000e+00> : vector<16xf32>
    %6 = vector.multi_reduction <add>, %5, %cst_2 [1] : vector<16x128xf32> to vector<16xf32>
    %7 = vector.shape_cast %6 : vector<16xf32> to vector<16x1xf32>
    %cst_3 = arith.constant 1.280000e+02 : f32
    %8 = vector.broadcast %cst_3 : f32 to vector<16x1xf32>
    %9 = arith.divf %7, %8 : vector<16x1xf32>
    %10 = arith.mulf %4, %4 : vector<16x1xf32>
    %11 = arith.subf %9, %10 : vector<16x1xf32>
    %12 = vector.broadcast %4 : vector<16x1xf32> to vector<16x128xf32>
    %13 = arith.subf %0, %12 : vector<16x128xf32>
    %cst_4 = arith.constant 9.99999974E-6 : f32
    %14 = vector.broadcast %cst_4 : f32 to vector<16x1xf32>
    %15 = arith.addf %11, %14 : vector<16x1xf32>
    %16 = math.rsqrt %15 : vector<16x1xf32>
    %17 = vector.broadcast %16 : vector<16x1xf32> to vector<16x128xf32>
    %18 = arith.mulf %13, %17 : vector<16x128xf32>
    %c0_5 = arith.constant 0 : index
    %c0_6 = arith.constant 0 : index
    %19 = vector.load %arg3[%c0_5, %c0_6] : memref<1x128xf32, #tpu.memory_space<vmem>>, vector<1x128xf32>
    %20 = vector.broadcast %19 : vector<1x128xf32> to vector<16x128xf32>
    %21 = arith.mulf %18, %20 : vector<16x128xf32>
    %c0_7 = arith.constant 0 : index
    %c0_8 = arith.constant 0 : index
    %22 = vector.load %arg4[%c0_7, %c0_8] : memref<1x128xf32, #tpu.memory_space<vmem>>, vector<1x128xf32>
    %23 = vector.broadcast %22 : vector<1x128xf32> to vector<16x128xf32>
    %24 = arith.addf %21, %23 : vector<16x128xf32>
    %25 = arith.truncf %24 : vector<16x128xf32> to vector<16x128xbf16>
    %c0_9 = arith.constant 0 : index
    %c0_10 = arith.constant 0 : index
    %26 = vector.load %arg5[%c0_9, %c0_10] : memref<128x128xbf16, #tpu.memory_space<vmem>>, vector<128x128xbf16>
    %cst_11 = arith.constant dense<0.000000e+00> : vector<16x128xf32>
    %27 = tpu.matmul %25, %26, %cst_11 {dimension_numbers = #tpu.dot_dimension_numbers<[1], [0], [0], [1], [0, 0, 1, 1], [], []>} : vector<16x128xbf16>, vector<128x128xbf16>, vector<16x128xf32> -> vector<16x128xf32>
    %c0_12 = arith.constant 0 : index
    %c0_13 = arith.constant 0 : index
    %28 = vector.load %arg6[%c0_12, %c0_13] : memref<1x128xf32, #tpu.memory_space<vmem>>, vector<1x128xf32>
    %29 = vector.broadcast %28 : vector<1x128xf32> to vector<16x128xf32>
    %30 = arith.addf %27, %29 : vector<16x128xf32>
    %31 = arith.addf %0, %30 : vector<16x128xf32>
    %c0_14 = arith.constant 0 : index
    %c0_15 = arith.constant 0 : index
    %32 = vector.load %arg7[%c0_14, %c0_15] : memref<16x128xf32, #tpu.memory_space<vmem>>, vector<16x128xf32>
    tpu.vector_store %arg7[%c0_14, %c0_15], %31 {strides = array<i32>} : memref<16x128xf32, #tpu.memory_space<vmem>>, vector<16x128xf32>,
    return
  }
  func.func @transform_0(%arg0: i32, %arg1: memref<1xi32, #tpu.memory_space<smem>>) -> (i32, i32) {
    %c0_i32 = arith.constant 0 : i32
    %c0_i32_0 = arith.constant 0 : i32
    return %arg0, %c0_i32 : i32, i32
  }
  func.func @transform_1(%arg0: i32, %arg1: memref<1xi32, #tpu.memory_space<smem>>) -> (i32, i32) {
    %c0_i32 = arith.constant 0 : i32
    %c0_i32_0 = arith.constant 0 : i32
    %c0_i32_1 = arith.constant 0 : i32
    return %c0_i32, %c0_i32_0 : i32, i32
  }
  func.func @transform_2(%arg0: i32, %arg1: memref<1xi32, #tpu.memory_space<smem>>) -> (i32, i32) {
    %c0_i32 = arith.constant 0 : i32
    %c0_i32_0 = arith.constant 0 : i32
    %c0_i32_1 = arith.constant 0 : i32
    return %c0_i32, %c0_i32_0 : i32, i32
  }
  func.func @transform_3(%arg0: i32, %arg1: memref<1xi32, #tpu.memory_space<smem>>) -> (i32, i32) {
    %c0_i32 = arith.constant 0 : i32
    %c0_i32_0 = arith.constant 0 : i32
    %c0_i32_1 = arith.constant 0 : i32
    return %c0_i32, %c0_i32_0 : i32, i32
  }
  func.func @transform_4(%arg0: i32, %arg1: memref<1xi32, #tpu.memory_space<smem>>) -> (i32, i32) {
    %c0_i32 = arith.constant 0 : i32
    %c0_i32_0 = arith.constant 0 : i32
    %c0_i32_1 = arith.constant 0 : i32
    return %c0_i32, %c0_i32_0 : i32, i32
  }
  func.func @transform_5(%arg0: i32, %arg1: memref<1xi32, #tpu.memory_space<smem>>) -> (i32, i32) {
    %c0_i32 = arith.constant 0 : i32
    %c0_i32_0 = arith.constant 0 : i32
    return %arg0, %c0_i32 : i32, i32
  }
}

</mosaic_0001>

<bundles_post_ra>
// kernel: tpu_custom_call.1
= control target key start
LH: loop header
LB: loop body
LE: loop exit
PB: predicated region body
PF: predicated region fallthrough
CT: control target
= control target key end

     0   :  { %12 = vsyncpa [#allocation5], 0  ;;  %s443_s0 = inlined_call_operand.<no memory space> [shape: s32[1], index: 0, kind: input, shape index: {}]   ;;  %s444_s1 = inlined_call_operand.hbm [shape: f32[16,128], index: 1, kind: input, shape index: {}]   ;;  %s445_s2 = inlined_call_operand.vmem [shape: f32[1,128], index: 2, kind: input, shape index: {}]   ;;  %s446_s3 = inlined_call_operand.vmem [shape: f32[1,128], index: 3, kind: input, shape index: {}]   ;;  %s447_s4 = inlined_call_operand.hbm [shape: bf16[128,128], index: 4, kind: input, shape index: {}]   ;;  %s448_s5 = inlined_call_operand.vmem [shape: f32[1,128], index: 5, kind: input, shape index: {}]   ;;  %s449_s6 = inlined_call_operand.hbm [shape: f32[16,128], index: 6, kind: output, shape index: {}]  }
   0x1   :  { %13 = vsyncpa [#allocation8], 0 }
   0x2   :  { %14 = vsyncpa [#allocation6], 0  ;;  %s361_s0 = smov [#allocation4]  }
   0x3   :  { %s20_s21 = sshll.u32 %s361_s0, 4  ;;  %s21_s21 = int_to_ptr.vmem [resolvable:$true] %s20_s21 }
   0x4   :  { %s303_s22 = scalar_lea.vmem %s21_s21, 256  ;;  %p308_p1 = scmp.lt.s32.totalorder %s21_s21, %s21_s21 }
   0x5   :  { %p304_p0 = scmp.ne.s32.totalorder %s21_s21, %s303_s22  ;;  %p309_p2 = scmp.lt.s32.totalorder %s303_s22, %s303_s22 }
   0x7   :  { %p310_p3 = por %p309_p2, %p308_p1 }
   0x9   :  { %p311_p4 = pnand %p310_p3, %p304_p0 }
   0xb   :  { %314 = shalt.err (!%p311_p4)
}
   0xc   :  { %s362_s23 = smov 128   ;;  %s363_s24 = smov 8  }
   0xd   :  { %26 = dma.hbm_to_vmem [thread:$0]  %s444_s1, 256, %s21_s21, [#allocation5], %s362_s23, %s362_s23, %s363_s24  }
   0xe   :  { %s364_s27 = smov [#allocation7]  }
   0xf   :  { %s36_s28 = sshll.u32 %s364_s27, 4  ;;  %s37_s28 = int_to_ptr.vmem [resolvable:$true] %s36_s28 }
  0x10   :  { %s323_s29 = scalar_lea.vmem %s37_s28, 1024  ;;  %p328_p6 = scmp.lt.s32.totalorder %s37_s28, %s37_s28 }
  0x11   :  { %p324_p5 = scmp.ne.s32.totalorder %s37_s28, %s323_s29  ;;  %p329_p7 = scmp.lt.s32.totalorder %s323_s29, %s323_s29 }
  0x13   :  { %p330_p8 = por %p329_p7, %p328_p6 }
  0x15   :  { %p331_p9 = pnand %p330_p8, %p324_p5 }
  0x17   :  { %334 = shalt.err (!%p331_p9)
}
  0x18   :  { %s365_s30 = smov 64   ;;  %s366_s7 = smov 4  }
  0x19   :  { %42 = dma.hbm_to_vmem [thread:$0]  %s447_s4, 1024, %s37_s28, [#allocation8], %s365_s30, %s365_s30, %s366_s7  }
  0x1a   :  { %355 = dma.done.wait [#allocation5], 256  }
  0x1b   :  { %356 = vsyncadd [#allocation5], 4294967040 }
  0x1c   :  { %357 = dma.done.wait [#allocation8], 1024  }
  0x1d   :  { %358 = vsyncadd [#allocation8], 4294966272  ;;  %v414_v0 = vld [vmem:[#allocation4] sm:$0xff]  ;;  %v416_v1 = vld [vmem:[#allocation4 + $0x8] sm:$0xff]  ;;  %v367_v5 = vmov 0.0   ;;  %vm368_vm0 = vmmov 0  }
  0x1e   :  { %54 = vadd.xlane.f32.xlu0 %v414_v0  ;;  %v61_v2 = vmul.f32 %v414_v0, %v414_v0  ;;  %v62_v3 = vmul.f32 %v416_v1, %v416_v1  ;;  %v283_v4 = vld [vmem:[#allocation7 + $0x38] sm:$0xff]   ;;  %254 = vmatprep.subr.bf16.mxu0 %v367_v5  ;;  %v284_v6 = vld [vmem:[#allocation7 + $0x30] sm:$0xff]   ;;  %v285_v7 = vld [vmem:[#allocation7 + $0x28] sm:$0xff]  }
  0x1f   :  { %255 = vmatpush3.bf16.msra.mxu0 %v283_v4  ;;  %v286_v8 = vld [vmem:[#allocation7 + $0x20] sm:$0xff]   ;;  %270 = vmatprep.mubr.msk.bf16.mxu0 %vm368_vm0, %v367_v5  ;;  %v287_v9 = vld [vmem:[#allocation7 + $0x18] sm:$0xff]   ;;  %v288_v10 = vld [vmem:[#allocation7 + $0x10] sm:$0xff]  }
  0x20   :  { %63 = vadd.xlane.f32.xlu1 %v61_v2  ;;  %256 = vmatprep.subr.bf16.mxu0 %v367_v5  ;;  %v289_v11 = vld [vmem:[#allocation7 + $0x8] sm:$0xff]   ;;  %v290_v12 = vld [vmem:[#allocation7] sm:$0xff]   ;;  %v234_v30 = vld [vmem:[%s445_s2] ss:$0 sm:$0xff]  ;;  %s369_s2 = smov [#allocation9]  }
  0x21   :  { %v235_v35 = vld [vmem:[%s446_s3] ss:$0 sm:$0xff]  ;;  %s221_s14 = sshll.u32 %s369_s2, 4  ;;  %s222_s14 = int_to_ptr.vmem [resolvable:$true] %s221_s14 }
  0x22   :  { %56 = vadd.xlane.f32.xlu0 %v416_v1  ;;  %v236_v40 = vld [vmem:[%s448_s5] ss:$0 sm:$0xff]  ;;  %s335_s3 = scalar_lea.vmem %s222_s14, 256  ;;  %p340_p11 = scmp.lt.s32.totalorder %s222_s14, %s222_s14 }
  0x23   :  { %257 = vmatpush3.bf16.msra.mxu0 %v284_v6  ;;  %p336_p10 = scmp.ne.s32.totalorder %s222_s14, %s335_s3  ;;  %p341_p12 = scmp.lt.s32.totalorder %s335_s3, %s335_s3 }
  0x24   :  { %65 = vadd.xlane.f32.xlu1 %v62_v3  ;;  %258 = vmatprep.subr.bf16.mxu0 %v367_v5 }
  0x25   :  { %p342_p13 = por %p341_p12, %p340_p11 }
  0x27   :  { %259 = vmatpush3.bf16.msra.mxu0 %v285_v7  ;;  %p343_p0 = pnand %p342_p13, %p336_p10 }
  0x28   :  { %260 = vmatprep.subr.bf16.mxu0 %v367_v5 }
  0x2b   :  { %261 = vmatpush3.bf16.msra.mxu0 %v286_v8 }
  0x2c   :  { %262 = vmatprep.subr.bf16.mxu0 %v367_v5 }
  0x2f   :  { %263 = vmatpush3.bf16.msra.mxu0 %v287_v9 }
  0x30   :  { %264 = vmatprep.subr.bf16.mxu0 %v367_v5 }
  0x33   :  { %265 = vmatpush3.bf16.msra.mxu0 %v288_v10 }
  0x34   :  { %266 = vmatprep.subr.bf16.mxu0 %v367_v5 }
  0x37   :  { %267 = vmatpush3.bf16.msra.mxu0 %v289_v11 }
  0x38   :  { %268 = vmatprep.subr.bf16.mxu0 %v367_v5 }
  0x3b   :  { %269 = vmatpush3.bf16.msra.mxu0 %v290_v12 }
  0xa7   :  { %v55_v13 = vpop.xlane.xlu0 %54 }
  0xa8   :  { %v59_v14 = vmul.f32 0.0078125, %v55_v13 }
  0xa9   :  { %v64_v15 = vpop.xlane.xlu1 %63 }
  0xaa   :  { %v69_v16 = vmul.f32 %v59_v14, %v59_v14  ;;  %v67_v17 = vmul.f32 0.0078125, %v64_v15  ;;  %v73_v27 = vsub.f32 %v414_v0, %v59_v14 }
  0xab   :  { %v57_v18 = vpop.xlane.xlu0 %56 }
  0xac   :  { %v71_v19 = vsub.f32 %v67_v17, %v69_v16  ;;  %v60_v20 = vmul.f32 0.0078125, %v57_v18 }
  0xad   :  { %v66_v21 = vpop.xlane.xlu1 %65 }
  0xae   :  { %v75_v22 = vadd.f32 1e-05, %v71_v19  ;;  %v70_v23 = vmul.f32 %v60_v20, %v60_v20  ;;  %v68_v24 = vmul.f32 0.0078125, %v66_v21  ;;  %v74_v31 = vsub.f32 %v416_v1, %v60_v20 }
  0xb0   :  { %291 = vrsqrt.f32 %v75_v22  ;;  %v72_v25 = vsub.f32 %v68_v24, %v70_v23 }
  0xb2   :  { %v76_v26 = vadd.f32 1e-05, %v72_v25 }
  0xb4   :  { %293 = vrsqrt.f32 %v76_v26 }
  0xbd   :  { %v292_v28 = vpop.eup %291 }
  0xbe   :  { %v79_v29 = vmul.f32 %v292_v28, %v73_v27 }
  0xc0   :  { %v88_v34 = vmul.f32 %v234_v30, %v79_v29 }
  0xc1   :  { %v294_v32 = vpop.eup %293 }
  0xc2   :  { %v80_v33 = vmul.f32 %v294_v32, %v74_v31  ;;  %v97_v37 = vadd.f32 %v235_v35, %v88_v34 }
  0xc4   :  { %v89_v36 = vmul.f32 %v234_v30, %v80_v33 }
  0xc6   :  { %v98_v38 = vadd.f32 %v235_v35, %v89_v36 }
  0xc8   :  { %v99_v39 = vpack.c.bf16 %v98_v38, %v97_v37 }
  0xca   :  { %271 = vmatmul.mubr.bf16.vlgmr.msra.gmra.mxu0 %v99_v39 }
 0x18a   :  { %v205_v41 = vpop.f32.mrf.mxu0 }
 0x18b   :  { %v206_v42 = vadd.f32 %v236_v40, %v205_v41 }
 0x18c   :  { %v272_v43 = vpop.f32.mrf.mxu0 }
 0x18d   :  { %v212_v44 = vadd.f32 %v206_v42, %v414_v0 }
 0x18e   :  { %v208_v45 = vpop.f32.mrf.mxu0 }
 0x18f   :  { %214 = vst [vmem:[#allocation9] sm:$0xff] %v212_v44  ;;  %v209_v46 = vadd.f32 %v236_v40, %v208_v45 }
 0x190   :  { %v273_v47 = vpop.f32.mrf.mxu0 }
 0x191   :  { %v213_v48 = vadd.f32 %v209_v46, %v416_v1 }
 0x193   :  { %215 = vst [vmem:[#allocation9 + $0x8] sm:$0xff] %v213_v48 }
 0x194   :  { %346 = shalt.err (!%p343_p0)
}
 0x195   :  { %227 = dma.vmem_to_hbm [thread:$0]  %s222_s14, 256, %s449_s6, [#allocation6], %s362_s23, %s362_s23, %s363_s24  }
 0x196   :  { %359 = dma.done.wait [#allocation6], 256  }
 0x197   :  { %360 = vsyncadd [#allocation6], 4294967040 }
 0x198   :  { %231 = vsyncpa [#allocation5], 1 }
 0x199   :  { %232 = vsyncpa [#allocation8], 1 }
 0x19a   :  { %233 = vsyncpa [#allocation6], 1 }

</bundles_post_ra>
